<compile_context>
chip_gen: v7x
topology: tpu7x:2x2x1
jax: 0.10.0
libtpu: 0.0.40
codegen_flags: <defaults>
</compile_context>

<pallas_src>
import functools

import jax
import jax.numpy as jnp
from jax import lax
from jax.experimental import pallas as pl
from jax.experimental.pallas import tpu as pltpu


_NEG_BIG = -1e30  # finite stand-in for -inf (keeps intermediates NaN/Inf free)


def _round_up(x, n):
    return (x + n - 1) // n * n


def _softplus(x):
    # stable softplus (matches torch.nn.Softplus output)
    return jnp.maximum(x, 0.0) + jnp.log1p(jnp.exp(-jnp.abs(x)))


# ---------------------------------------------------------------------------
# Main kernel: streaming masked logsumexp over column tiles, per row tile
# ---------------------------------------------------------------------------
def _circle_row_kernel(en_row_ref, en_col_ref, mask_ref, loss_ref,
                       m_p, s_p, m_n, s_n, *, m, gamma, tile_n, col_resident):
    j = pl.program_id(1)
    nj = pl.num_programs(1)

    @pl.when(j == 0)
    def _():
        m_p[...] = jnp.full_like(m_p, _NEG_BIG)
        m_n[...] = jnp.full_like(m_n, _NEG_BIG)
        s_p[...] = jnp.zeros_like(s_p)
        s_n[...] = jnp.zeros_like(s_n)

    # column operand: (D, tile_n), lane-dense; either sliced out of a
    # VMEM-resident (D, Mp_c) slab or delivered as a streamed block.
    if col_resident:
        start = pl.multiple_of(j * tile_n, tile_n)
        en_col = en_col_ref[:, pl.ds(start, tile_n)]
    else:
        en_col = en_col_ref[...]

    # cosine-similarity tile on the MXU: plain (m,k)@(k,n), f32 accumulate.
    d = jnp.dot(en_row_ref[...], en_col, preferred_element_type=jnp.float32)

    # packed mask bitfield: bit0 = pos, bit1 = neg (disjoint by construction)
    mb = mask_ref[...]
    pos = (mb & 1) != 0
    neg = (mb & 2) != 0

    op, on = 1.0 + m, -m
    delta_p, delta_n = 1.0 - m, m
    logit_p = (-gamma) * jnp.maximum(op - d, 0.0) * (d - delta_p)
    logit_n = gamma * jnp.maximum(d - on, 0.0) * (d - delta_n)
    # torch order: pos logits written first, then neg logits overwrite overlap
    val = jnp.where(neg, logit_n, logit_p)

    # online max update for the pos-masked and neg-masked row maxima
    tm_p = jnp.max(jnp.where(pos, val, _NEG_BIG), axis=1, keepdims=True)
    tm_n = jnp.max(jnp.where(neg, val, _NEG_BIG), axis=1, keepdims=True)
    m_p_new = jnp.maximum(m_p[...], tm_p)
    m_n_new = jnp.maximum(m_n[...], tm_n)

    # single exp pass: each element shifted by the running max of the mask it
    # belongs to; entries in neither mask get the sentinel (exp -> 0).
    arg = jnp.where(pos, val - m_p_new,
                    jnp.where(neg, val - m_n_new, _NEG_BIG))
    e = jnp.exp(arg)

    tile_s_p = jnp.sum(jnp.where(pos, e, 0.0), axis=1, keepdims=True)
    tile_s_n = jnp.sum(jnp.where(neg, e, 0.0), axis=1, keepdims=True)

    # rescale running sums to the new maxima and accumulate
    s_p[...] = s_p[...] * jnp.exp(m_p[...] - m_p_new) + tile_s_p
    s_n[...] = s_n[...] * jnp.exp(m_n[...] - m_n_new) + tile_s_n
    m_p[...] = m_p_new
    m_n[...] = m_n_new

    @pl.when(j == nj - 1)
    def _():
        sp, sn = s_p[...], s_n[...]
        has_both = (sp > 0.0) & (sn > 0.0)   # row has >=1 pos and >=1 neg
        lse_p = jnp.log(jnp.maximum(sp, 1e-30)) + m_p[...]
        lse_n = jnp.log(jnp.maximum(sn, 1e-30)) + m_n[...]
        loss_ref[...] = jnp.where(has_both, _softplus(lse_p + lse_n), 0.0)


# ---------------------------------------------------------------------------
# Wrapper
# ---------------------------------------------------------------------------
def _default_tile_n():
    try:
        info = pltpu.get_tpu_info()
        if getattr(info, "vmem_capacity_bytes", 128 << 20) <= (64 << 20):
            return 512        # v7x: 64 MiB VMEM per TC -> smaller column tile
    except Exception:
        pass
    return 1024               # v5e / v6e


def _choose_tiles(M, tile_m, tile_n):
    # lane-dense column tile (multiple of 128)
    tile_n = min(int(tile_n), _round_up(M, 128))
    tile_n = max(128, tile_n - tile_n % 128)
    # row tile multiple of 32 (int8 sublane packing friendly)
    tile_m = min(int(tile_m), _round_up(M, 32))
    tile_m = max(32, tile_m - tile_m % 32)
    # prefer >=2 row tiles so the "parallel" axis feeds both v7x TensorCores
    while tile_m > 32 and _round_up(M, tile_m) // tile_m < 2:
        tile_m = max(32, (tile_m // 2) - (tile_m // 2) % 32)
    return tile_m, tile_n


def circle_loss(embeddings, pos_mask, neg_mask, *, m=0.25, gamma=256.0,
                tile_m=256, tile_n=None, col_resident=None):
    """CircleLoss forward (version='PML') computed with a Pallas TPU kernel.

    pos_mask / neg_mask must be disjoint (as produced from labels); overlapping
    entries would be counted with the pos shift in the neg sum.
    """
    M, D = embeddings.shape
    if tile_n is None:
        tile_n = _default_tile_n()
    tile_m, tile_n = _choose_tiles(M, tile_m, tile_n)
    Mp_r = _round_up(M, tile_m)   # row padding decoupled from column padding
    Mp_c = _round_up(M, tile_n)

    # --- L2-normalize once in plain JAX (F.normalize, eps=1e-12) ---
    e = jnp.asarray(embeddings, jnp.float32)
    en = e * lax.rsqrt(jnp.maximum(jnp.sum(e * e, axis=-1, keepdims=True), 1e-24))

    en_rows = jnp.pad(en, ((0, Mp_r - M), (0, 0)))             # (Mp_r, D)
    en_t = jnp.pad(en, ((0, Mp_c - M), (0, 0))).T               # (D, Mp_c) lane-dense

    # --- packed mask bitfield: bit0 = pos, bit1 = neg ---
    pos_b = jnp.asarray(pos_mask) != 0
    neg_b = jnp.asarray(neg_mask) != 0
    mask_i8 = pos_b.astype(jnp.int8) + 2 * neg_b.astype(jnp.int8)
    mask_i8 = jnp.pad(mask_i8, ((0, Mp_r - M), (0, Mp_c - M)))

    # keep the column operand VMEM-resident when small enough (2 buffers)
    if col_resident is None:
        col_resident = (D * Mp_c * 4) <= (8 << 20)

    if col_resident:
        col_spec = pl.BlockSpec((D, Mp_c), lambda i, j: (0, 0))
    else:
        col_spec = pl.BlockSpec((D, tile_n), lambda i, j: (0, j))

    # conservative scoped-VMEM estimate; cap at 48 MiB (v7x has 64 MiB / TC)
    col_block_bytes = (D * Mp_c if col_resident else D * tile_n) * 4
    est = (2 * (tile_m * D * 4 + col_block_bytes + tile_m * tile_n + tile_m * 4)
           + 14 * tile_m * tile_n * 4 + (1 << 20))
    vmem_limit = int(min(max(est, 32 << 20), 48 << 20))

    kernel = functools.partial(_circle_row_kernel, m=float(m), gamma=float(gamma),
                               tile_n=tile_n, col_resident=col_resident)
    losses = pl.pallas_call(
        kernel,
        out_shape=jax.ShapeDtypeStruct((Mp_r, 1), jnp.float32),
        grid=(Mp_r // tile_m, Mp_c // tile_n),
        in_specs=[
            pl.BlockSpec((tile_m, D), lambda i, j: (i, 0)),        # row embeddings
            col_spec,                                              # column embeddings^T
            pl.BlockSpec((tile_m, tile_n), lambda i, j: (i, j)),   # packed mask (int8)
        ],
        out_specs=pl.BlockSpec((tile_m, 1), lambda i, j: (i, 0)),
        scratch_shapes=[pltpu.VMEM((tile_m, 1), jnp.float32)] * 4,  # m_p, s_p, m_n, s_n
        compiler_params=pltpu.CompilerParams(
            dimension_semantics=("parallel", "arbitrary"),
            vmem_limit_bytes=vmem_limit),
    )(en_rows, en_t, mask_i8)

    # --- tiny epilogue in JAX: mean over rows with loss > 0 (0 if none) ---
    loss_rows = losses[:M, 0]
    nz = loss_rows > 0.0
    cnt = jnp.sum(nz.astype(jnp.float32))
    total = jnp.sum(jnp.where(nz, loss_rows, 0.0))
    return jnp.where(cnt > 0.0, total / cnt, 0.0)


# ---------------------------------------------------------------------------
# Pure-JAX reference (mirrors the PyTorch forward) for validation
# ---------------------------------------------------------------------------
def _masked_logsumexp(x, mask_f):
    mask = mask_f > 0.5
    max_vals = jnp.max(jnp.where(mask, x, -jnp.inf), axis=1, keepdims=True)
    inside_exp = jnp.where(mask, x - max_vals, 0.0)
    exp = jnp.exp(inside_exp) * mask_f
    inside_log = jnp.sum(exp, axis=1, keepdims=True)
    inside_log = jnp.where(inside_log == 0.0, jnp.exp(-max_vals), inside_log)
    return jnp.log(inside_log) + max_vals


def _reference_circle_loss(embeddings, pos_mask, neg_mask, m=0.25, gamma=256.0):
    e = embeddings.astype(jnp.float32)
    en = e / jnp.maximum(jnp.linalg.norm(e, axis=-1, keepdims=True), 1e-12)
    d = jnp.matmul(en, en.T, precision=lax.Precision.HIGHEST)
    pos_f = pos_mask.astype(jnp.float32)
    neg_f = neg_mask.astype(jnp.float32)
    pos = pos_f > 0.5
    neg = neg_f > 0.5
    logit_p = -gamma * jnp.maximum((1.0 + m) - d, 0.0) * (d - (1.0 - m))
    logit_n = gamma * jnp.maximum(d - (-m), 0.0) * (d - m)
    new_mat = jnp.where(pos, logit_p, 0.0)
    new_mat = jnp.where(neg, logit_n, new_mat)
    lse_p = _masked_logsumexp(new_mat, pos_f)
    lse_n = _masked_logsumexp(new_mat, neg_f)
    losses = jax.nn.softplus(lse_p + lse_n)
    keep = (pos_f.sum(1, keepdims=True) > 0) & (neg_f.sum(1, keepdims=True) > 0)
    losses = jnp.where(keep, losses, 0.0)
    nz = losses > 0
    cnt = nz.sum()
    return jnp.where(cnt > 0, jnp.where(nz, losses, 0.0).sum() / cnt, 0.0)


if __name__ == "__main__":
    key = jax.random.PRNGKey(0)

    def make_inputs(k, n_anchor, dim):
        m_rows = 2 * n_anchor
        emb = jax.random.normal(k, (m_rows, dim), dtype=jnp.float32)
        labels = jnp.concatenate([jnp.arange(n_anchor), jnp.arange(n_anchor)])
        same = labels[:, None] == labels[None, :]
        not_self = ~jnp.eye(m_rows, dtype=bool)
        pos = (same & not_self).astype(jnp.float32)
        neg = (~same).astype(jnp.float32)
        return emb, pos, neg

    k1, k2 = jax.random.split(key)

    # Case 1: shapes implied by the module (N=8 anchors -> 2*N=16 embeddings,
    # D=32); exercises the VMEM-resident column-operand path.
    emb, pos, neg = make_inputs(k1, 8, 32)
    out = jax.block_until_ready(circle_loss(emb, pos, neg, m=0.25, gamma=256.0))
    ref = _reference_circle_loss(emb, pos, neg)
    assert jnp.isfinite(out), out
    # gamma=256 amplifies tiny matmul/accumulation rounding -> loose tolerance.
    assert jnp.allclose(out, ref, rtol=1e-2, atol=1e-2), (out, ref)

    # Case 2 (still small): M=192, D=64 with 128x128 tiles -> exercises the
    # 2x2 grid, decoupled zero-padding (192 -> 256 on both axes), the streamed
    # (non-resident) column-operand path and the online masked-LSE accumulator.
    emb2, pos2, neg2 = make_inputs(k2, 96, 64)
    out2 = jax.block_until_ready(
        circle_loss(emb2, pos2, neg2, tile_m=128, tile_n=128, col_resident=False))
    ref2 = _reference_circle_loss(emb2, pos2, neg2)
    assert jnp.isfinite(out2), out2
    assert jnp.allclose(out2, ref2, rtol=1e-2, atol=1e-2), (out2, ref2)

    print("KERNEL_OK")
</pallas_src>

<mosaic_0001>
module attributes {stable_mosaic.version = 11 : i64} {
  func.func @_circle_row_kernel(%arg0: i32, %arg1: i32, %arg2: memref<32x32xf32, #tpu.memory_space<vmem>>, %arg3: memref<32x128xf32, #tpu.memory_space<vmem>>, %arg4: memref<32x128xi8, #tpu.memory_space<vmem>>, %arg5: memref<32x1xf32, #tpu.memory_space<vmem>>, %arg6: memref<32x1xf32, #tpu.memory_space<vmem>>, %arg7: memref<32x1xf32, #tpu.memory_space<vmem>>, %arg8: memref<32x1xf32, #tpu.memory_space<vmem>>, %arg9: memref<32x1xf32, #tpu.memory_space<vmem>>) attributes {dimension_semantics = [#tpu.dimension_semantics<parallel>, #tpu.dimension_semantics<arbitrary>], iteration_bounds = array<i64: 1, 1>, scalar_prefetch = 0 : i64, scratch_operands = 4 : i64, tpu.core_type = #tpu.core_type<tc>, window_params = [{transform_indices = @transform_0, window_bounds = array<i64: 32, 32>}, {pipeline_mode = #tpu.pipeline_mode<synchronous>, transform_indices = @transform_1, window_bounds = array<i64: 32, 128>}, {transform_indices = @transform_2, window_bounds = array<i64: 32, 128>}, {transform_indices = @transform_3, window_bounds = array<i64: 32, 1>}]} {
    %c0_i32 = arith.constant 0 : i32
    %0 = arith.cmpi eq, %arg1, %c0_i32 : i32
    %1 = arith.extui %0 : i1 to i32
    %c0_i32_0 = arith.constant 0 : i32
    %2 = arith.cmpi ne, %1, %c0_i32_0 : i32
    scf.if %2 {
      %cst_45 = arith.constant -1.000000e+30 : f32
      %84 = vector.broadcast %cst_45 : f32 to vector<32x1xf32>
      %c0_46 = arith.constant 0 : index
      %c0_47 = arith.constant 0 : index
      %85 = vector.load %arg6[%c0_46, %c0_47] : memref<32x1xf32, #tpu.memory_space<vmem>>, vector<32x1xf32>
      tpu.vector_store %arg6[%c0_46, %c0_47], %84 {strides = array<i32>} : memref<32x1xf32, #tpu.memory_space<vmem>>, vector<32x1xf32>,
      %cst_48 = arith.constant -1.000000e+30 : f32
      %86 = vector.broadcast %cst_48 : f32 to vector<32x1xf32>
      %c0_49 = arith.constant 0 : index
      %c0_50 = arith.constant 0 : index
      %87 = vector.load %arg8[%c0_49, %c0_50] : memref<32x1xf32, #tpu.memory_space<vmem>>, vector<32x1xf32>
      tpu.vector_store %arg8[%c0_49, %c0_50], %86 {strides = array<i32>} : memref<32x1xf32, #tpu.memory_space<vmem>>, vector<32x1xf32>,
      %cst_51 = arith.constant 0.000000e+00 : f32
      %88 = vector.broadcast %cst_51 : f32 to vector<32x1xf32>
      %c0_52 = arith.constant 0 : index
      %c0_53 = arith.constant 0 : index
      %89 = vector.load %arg7[%c0_52, %c0_53] : memref<32x1xf32, #tpu.memory_space<vmem>>, vector<32x1xf32>
      tpu.vector_store %arg7[%c0_52, %c0_53], %88 {strides = array<i32>} : memref<32x1xf32, #tpu.memory_space<vmem>>, vector<32x1xf32>,
      %cst_54 = arith.constant 0.000000e+00 : f32
      %90 = vector.broadcast %cst_54 : f32 to vector<32x1xf32>
      %c0_55 = arith.constant 0 : index
      %c0_56 = arith.constant 0 : index
      %91 = vector.load %arg9[%c0_55, %c0_56] : memref<32x1xf32, #tpu.memory_space<vmem>>, vector<32x1xf32>
      tpu.vector_store %arg9[%c0_55, %c0_56], %90 {strides = array<i32>} : memref<32x1xf32, #tpu.memory_space<vmem>>, vector<32x1xf32>,
    } else {
    }
    %c128_i32 = arith.constant 128 : i32
    %3 = arith.muli %arg1, %c128_i32 : i32
    %4 = tpu.assume_multiple %3, 128 : i32
    %c0 = arith.constant 0 : index
    %5 = arith.index_cast %4 : i32 to index
    %6 = vector.load %arg3[%c0, %5] : memref<32x128xf32, #tpu.memory_space<vmem>>, vector<32x128xf32>
    %c0_1 = arith.constant 0 : index
    %c0_2 = arith.constant 0 : index
    %7 = vector.load %arg2[%c0_1, %c0_2] : memref<32x32xf32, #tpu.memory_space<vmem>>, vector<32x32xf32>
    %cst = arith.constant dense<0.000000e+00> : vector<32x128xf32>
    %8 = tpu.matmul %7, %6, %cst {dimension_numbers = #tpu.dot_dimension_numbers<[1], [0], [0], [1], [0, 0, 1, 1], [], []>} : vector<32x32xf32>, vector<32x128xf32>, vector<32x128xf32> -> vector<32x128xf32>
    %c0_3 = arith.constant 0 : index
    %c0_4 = arith.constant 0 : index
    %9 = vector.load %arg4[%c0_3, %c0_4] : memref<32x128xi8, #tpu.memory_space<vmem>>, vector<32x128xi8>
    %c1_i8 = arith.constant 1 : i8
    %10 = vector.broadcast %c1_i8 : i8 to vector<32x128xi8>
    %11 = arith.andi %9, %10 : vector<32x128xi8>
    %c0_i8 = arith.constant 0 : i8
    %12 = vector.broadcast %c0_i8 : i8 to vector<32x128xi8>
    %13 = arith.cmpi ne, %11, %12 : vector<32x128xi8>
    %c2_i8 = arith.constant 2 : i8
    %14 = vector.broadcast %c2_i8 : i8 to vector<32x128xi8>
    %15 = arith.andi %9, %14 : vector<32x128xi8>
    %c0_i8_5 = arith.constant 0 : i8
    %16 = vector.broadcast %c0_i8_5 : i8 to vector<32x128xi8>
    %17 = arith.cmpi ne, %15, %16 : vector<32x128xi8>
    %cst_6 = arith.constant 1.250000e+00 : f32
    %18 = vector.broadcast %cst_6 : f32 to vector<32x128xf32>
    %19 = arith.subf %18, %8 : vector<32x128xf32>
    %cst_7 = arith.constant 0.000000e+00 : f32
    %20 = vector.broadcast %cst_7 : f32 to vector<32x128xf32>
    %21 = arith.maximumf %19, %20 : vector<32x128xf32>
    %cst_8 = arith.constant -2.560000e+02 : f32
    %22 = vector.broadcast %cst_8 : f32 to vector<32x128xf32>
    %23 = arith.mulf %22, %21 : vector<32x128xf32>
    %cst_9 = arith.constant 7.500000e-01 : f32
    %24 = vector.broadcast %cst_9 : f32 to vector<32x128xf32>
    %25 = arith.subf %8, %24 : vector<32x128xf32>
    %26 = arith.mulf %23, %25 : vector<32x128xf32>
    %cst_10 = arith.constant -2.500000e-01 : f32
    %27 = vector.broadcast %cst_10 : f32 to vector<32x128xf32>
    %28 = arith.subf %8, %27 : vector<32x128xf32>
    %cst_11 = arith.constant 0.000000e+00 : f32
    %29 = vector.broadcast %cst_11 : f32 to vector<32x128xf32>
    %30 = arith.maximumf %28, %29 : vector<32x128xf32>
    %cst_12 = arith.constant 2.560000e+02 : f32
    %31 = vector.broadcast %cst_12 : f32 to vector<32x128xf32>
    %32 = arith.mulf %31, %30 : vector<32x128xf32>
    %cst_13 = arith.constant 2.500000e-01 : f32
    %33 = vector.broadcast %cst_13 : f32 to vector<32x128xf32>
    %34 = arith.subf %8, %33 : vector<32x128xf32>
    %35 = arith.mulf %32, %34 : vector<32x128xf32>
    %36 = arith.select %17, %35, %26 : vector<32x128xi1>, vector<32x128xf32>
    %cst_14 = arith.constant -1.000000e+30 : f32
    %37 = vector.broadcast %cst_14 : f32 to vector<32x128xf32>
    %38 = arith.select %13, %36, %37 : vector<32x128xi1>, vector<32x128xf32>
    %cst_15 = arith.constant dense<0xFF800000> : vector<32xf32>
    %39 = vector.multi_reduction <maximumf>, %38, %cst_15 [1] : vector<32x128xf32> to vector<32xf32>
    %40 = vector.shape_cast %39 : vector<32xf32> to vector<32x1xf32>
    %cst_16 = arith.constant -1.000000e+30 : f32
    %41 = vector.broadcast %cst_16 : f32 to vector<32x128xf32>
    %42 = arith.select %17, %36, %41 : vector<32x128xi1>, vector<32x128xf32>
    %cst_17 = arith.constant dense<0xFF800000> : vector<32xf32>
    %43 = vector.multi_reduction <maximumf>, %42, %cst_17 [1] : vector<32x128xf32> to vector<32xf32>
    %44 = vector.shape_cast %43 : vector<32xf32> to vector<32x1xf32>
    %c0_18 = arith.constant 0 : index
    %c0_19 = arith.constant 0 : index
    %45 = vector.load %arg6[%c0_18, %c0_19] : memref<32x1xf32, #tpu.memory_space<vmem>>, vector<32x1xf32>
    %46 = arith.maximumf %45, %40 : vector<32x1xf32>
    %c0_20 = arith.constant 0 : index
    %c0_21 = arith.constant 0 : index
    %47 = vector.load %arg8[%c0_20, %c0_21] : memref<32x1xf32, #tpu.memory_space<vmem>>, vector<32x1xf32>
    %48 = arith.maximumf %47, %44 : vector<32x1xf32>
    %49 = vector.broadcast %46 : vector<32x1xf32> to vector<32x128xf32>
    %50 = arith.subf %36, %49 : vector<32x128xf32>
    %51 = vector.broadcast %48 : vector<32x1xf32> to vector<32x128xf32>
    %52 = arith.subf %36, %51 : vector<32x128xf32>
    %cst_22 = arith.constant -1.000000e+30 : f32
    %53 = vector.broadcast %cst_22 : f32 to vector<32x128xf32>
    %54 = arith.select %17, %52, %53 : vector<32x128xi1>, vector<32x128xf32>
    %55 = arith.select %13, %50, %54 : vector<32x128xi1>, vector<32x128xf32>
    %56 = math.exp %55 : vector<32x128xf32>
    %cst_23 = arith.constant 0.000000e+00 : f32
    %57 = vector.broadcast %cst_23 : f32 to vector<32x128xf32>
    %58 = arith.select %13, %56, %57 : vector<32x128xi1>, vector<32x128xf32>
    %cst_24 = arith.constant dense<0.000000e+00> : vector<32xf32>
    %59 = vector.multi_reduction <add>, %58, %cst_24 [1] : vector<32x128xf32> to vector<32xf32>
    %60 = vector.shape_cast %59 : vector<32xf32> to vector<32x1xf32>
    %cst_25 = arith.constant 0.000000e+00 : f32
    %61 = vector.broadcast %cst_25 : f32 to vector<32x128xf32>
    %62 = arith.select %17, %56, %61 : vector<32x128xi1>, vector<32x128xf32>
    %cst_26 = arith.constant dense<0.000000e+00> : vector<32xf32>
    %63 = vector.multi_reduction <add>, %62, %cst_26 [1] : vector<32x128xf32> to vector<32xf32>
    %64 = vector.shape_cast %63 : vector<32xf32> to vector<32x1xf32>
    %c0_27 = arith.constant 0 : index
    %c0_28 = arith.constant 0 : index
    %65 = vector.load %arg7[%c0_27, %c0_28] : memref<32x1xf32, #tpu.memory_space<vmem>>, vector<32x1xf32>
    %c0_29 = arith.constant 0 : index
    %c0_30 = arith.constant 0 : index
    %66 = vector.load %arg6[%c0_29, %c0_30] : memref<32x1xf32, #tpu.memory_space<vmem>>, vector<32x1xf32>
    %67 = arith.subf %66, %46 : vector<32x1xf32>
    %68 = math.exp %67 : vector<32x1xf32>
    %69 = arith.mulf %65, %68 : vector<32x1xf32>
    %70 = arith.addf %69, %60 : vector<32x1xf32>
    %c0_31 = arith.constant 0 : index
    %c0_32 = arith.constant 0 : index
    %71 = vector.load %arg7[%c0_31, %c0_32] : memref<32x1xf32, #tpu.memory_space<vmem>>, vector<32x1xf32>
    tpu.vector_store %arg7[%c0_31, %c0_32], %70 {strides = array<i32>} : memref<32x1xf32, #tpu.memory_space<vmem>>, vector<32x1xf32>,
    %c0_33 = arith.constant 0 : index
    %c0_34 = arith.constant 0 : index
    %72 = vector.load %arg9[%c0_33, %c0_34] : memref<32x1xf32, #tpu.memory_space<vmem>>, vector<32x1xf32>
    %c0_35 = arith.constant 0 : index
    %c0_36 = arith.constant 0 : index
    %73 = vector.load %arg8[%c0_35, %c0_36] : memref<32x1xf32, #tpu.memory_space<vmem>>, vector<32x1xf32>
    %74 = arith.subf %73, %48 : vector<32x1xf32>
    %75 = math.exp %74 : vector<32x1xf32>
    %76 = arith.mulf %72, %75 : vector<32x1xf32>
    %77 = arith.addf %76, %64 : vector<32x1xf32>
    %c0_37 = arith.constant 0 : index
    %c0_38 = arith.constant 0 : index
    %78 = vector.load %arg9[%c0_37, %c0_38] : memref<32x1xf32, #tpu.memory_space<vmem>>, vector<32x1xf32>
    tpu.vector_store %arg9[%c0_37, %c0_38], %77 {strides = array<i32>} : memref<32x1xf32, #tpu.memory_space<vmem>>, vector<32x1xf32>,
    %c0_39 = arith.constant 0 : index
    %c0_40 = arith.constant 0 : index
    %79 = vector.load %arg6[%c0_39, %c0_40] : memref<32x1xf32, #tpu.memory_space<vmem>>, vector<32x1xf32>
    tpu.vector_store %arg6[%c0_39, %c0_40], %46 {strides = array<i32>} : memref<32x1xf32, #tpu.memory_space<vmem>>, vector<32x1xf32>,
    %c0_41 = arith.constant 0 : index
    %c0_42 = arith.constant 0 : index
    %80 = vector.load %arg8[%c0_41, %c0_42] : memref<32x1xf32, #tpu.memory_space<vmem>>, vector<32x1xf32>
    tpu.vector_store %arg8[%c0_41, %c0_42], %48 {strides = array<i32>} : memref<32x1xf32, #tpu.memory_space<vmem>>, vector<32x1xf32>,
    %c0_i32_43 = arith.constant 0 : i32
    %81 = arith.cmpi eq, %arg1, %c0_i32_43 : i32
    %82 = arith.extui %81 : i1 to i32
    %c0_i32_44 = arith.constant 0 : i32
    %83 = arith.cmpi ne, %82, %c0_i32_44 : i32
    scf.if %83 {
      %c0_45 = arith.constant 0 : index
      %c0_46 = arith.constant 0 : index
      %84 = vector.load %arg7[%c0_45, %c0_46] : memref<32x1xf32, #tpu.memory_space<vmem>>, vector<32x1xf32>
      %c0_47 = arith.constant 0 : index
      %c0_48 = arith.constant 0 : index
      %85 = vector.load %arg9[%c0_47, %c0_48] : memref<32x1xf32, #tpu.memory_space<vmem>>, vector<32x1xf32>
      %cst_49 = arith.constant 0.000000e+00 : f32
      %86 = vector.broadcast %cst_49 : f32 to vector<32x1xf32>
      %87 = arith.cmpf ogt, %84, %86 : vector<32x1xf32>
      %cst_50 = arith.constant 0.000000e+00 : f32
      %88 = vector.broadcast %cst_50 : f32 to vector<32x1xf32>
      %89 = arith.cmpf ogt, %85, %88 : vector<32x1xf32>
      %90 = arith.andi %87, %89 : vector<32x1xi1>
      %cst_51 = arith.constant 1.000000e-30 : f32
      %91 = vector.broadcast %cst_51 : f32 to vector<32x1xf32>
      %92 = arith.maximumf %84, %91 : vector<32x1xf32>
      %93 = math.log %92 : vector<32x1xf32>
      %c0_52 = arith.constant 0 : index
      %c0_53 = arith.constant 0 : index
      %94 = vector.load %arg6[%c0_52, %c0_53] : memref<32x1xf32, #tpu.memory_space<vmem>>, vector<32x1xf32>
      %95 = arith.addf %93, %94 : vector<32x1xf32>
      %cst_54 = arith.constant 1.000000e-30 : f32
      %96 = vector.broadcast %cst_54 : f32 to vector<32x1xf32>
      %97 = arith.maximumf %85, %96 : vector<32x1xf32>
      %98 = math.log %97 : vector<32x1xf32>
      %c0_55 = arith.constant 0 : index
      %c0_56 = arith.constant 0 : index
      %99 = vector.load %arg8[%c0_55, %c0_56] : memref<32x1xf32, #tpu.memory_space<vmem>>, vector<32x1xf32>
      %100 = arith.addf %98, %99 : vector<32x1xf32>
      %101 = arith.addf %95, %100 : vector<32x1xf32>
      %cst_57 = arith.constant 0.000000e+00 : f32
      %102 = vector.broadcast %cst_57 : f32 to vector<32x1xf32>
      %103 = arith.maximumf %101, %102 : vector<32x1xf32>
      %104 = math.absf %101 : vector<32x1xf32>
      %cst_58 = arith.constant 0.000000e+00 : f32
      %105 = vector.broadcast %cst_58 : f32 to vector<32x1xf32>
      %106 = arith.subf %105, %104 : vector<32x1xf32>
      %107 = math.exp %106 : vector<32x1xf32>
      %108 = math.log1p %107 : vector<32x1xf32>
      %109 = arith.addf %103, %108 : vector<32x1xf32>
      %cst_59 = arith.constant 0.000000e+00 : f32
      %110 = vector.broadcast %cst_59 : f32 to vector<32x1xf32>
      %111 = arith.select %90, %109, %110 : vector<32x1xi1>, vector<32x1xf32>
      %c0_60 = arith.constant 0 : index
      %c0_61 = arith.constant 0 : index
      %112 = vector.load %arg5[%c0_60, %c0_61] : memref<32x1xf32, #tpu.memory_space<vmem>>, vector<32x1xf32>
      tpu.vector_store %arg5[%c0_60, %c0_61], %111 {strides = array<i32>} : memref<32x1xf32, #tpu.memory_space<vmem>>, vector<32x1xf32>,
    } else {
    }
    return
  }
  func.func @transform_0(%arg0: i32, %arg1: i32) -> (i32, i32) {
    %c0_i32 = arith.constant 0 : i32
    %c0_i32_0 = arith.constant 0 : i32
    return %arg0, %c0_i32 : i32, i32
  }
  func.func @transform_1(%arg0: i32, %arg1: i32) -> (i32, i32) {
    %c0_i32 = arith.constant 0 : i32
    %c0_i32_0 = arith.constant 0 : i32
    %c0_i32_1 = arith.constant 0 : i32
    return %c0_i32, %c0_i32_0 : i32, i32
  }
  func.func @transform_2(%arg0: i32, %arg1: i32) -> (i32, i32) {
    %c0_i32 = arith.constant 0 : i32
    return %arg0, %arg1 : i32, i32
  }
  func.func @transform_3(%arg0: i32, %arg1: i32) -> (i32, i32) {
    %c0_i32 = arith.constant 0 : i32
    %c0_i32_0 = arith.constant 0 : i32
    return %arg0, %c0_i32 : i32, i32
  }
}

</mosaic_0001>

<bundles_post_ra>
// kernel: tpu_custom_call.1
= control target key start
LH: loop header
LB: loop body
LE: loop exit
PB: predicated region body
PF: predicated region fallthrough
CT: control target
= control target key end

     0   :  { %8 = vsyncpa [#allocation7], 0  ;;  %s1215_s0 = inlined_call_operand.hbm [shape: f32[32,32], index: 0, kind: input, shape index: {}]   ;;  %s1216_s1 = inlined_call_operand.hbm [shape: f32[32,128], index: 1, kind: input, shape index: {}]   ;;  %s1217_s2 = inlined_call_operand.hbm [shape: s8[32,128], index: 2, kind: input, shape index: {}]   ;;  %s1218_s3 = inlined_call_operand.vmem [shape: f32[32,1], index: 3, kind: output, shape index: {}]  }
   0x1   :  { %9 = vsyncpa [#allocation9], 0  ;;  %s819_s12 = smov [#allocation8]   ;;  %s820_s14 = smov [#allocation6]  }
   0x2   :  { %s27_s13 = sshll.u32 %s819_s12, 4  ;;  %s15_s15 = sshll.u32 %s820_s14, 4  ;;  %s28_s13 = int_to_ptr.vmem [resolvable:$true] %s27_s13  ;;  %s847_s15 = int_to_ptr.vmem [resolvable:$true] %s15_s15 }
   0x3   :  { %s749_s18 = scalar_lea.hbm %s1216_s1, 512 }
   0x4   :  { %p750_p0 = scmp.ne.s32.totalorder %s1216_s1, %s749_s18  ;;  %p753_p1 = scmp.lt.u32.totalorder %s749_s18, %s1216_s1 }
   0x6   :  { %p755_p2 = pnand %p753_p1, %p750_p0 }
   0x8   :  { %758 = shalt.err (!%p755_p2)
}
   0x9   :  { %s759_s23 = scalar_lea.vmem %s28_s13, 512  ;;  %p764_p4 = scmp.lt.s32.totalorder %s28_s13, %s28_s13 }
   0xa   :  { %p760_p3 = scmp.ne.s32.totalorder %s28_s13, %s759_s23  ;;  %p765_p5 = scmp.lt.s32.totalorder %s759_s23, %s759_s23 }
   0xc   :  { %p766_p6 = por %p765_p5, %p764_p4 }
   0xe   :  { %p767_p7 = pnand %p766_p6, %p760_p3 }
  0x10   :  { %770 = shalt.err (!%p767_p7)
}
  0x11   :  { %s821_s24 = smov 128   ;;  %s822_s25 = smov 8  }
  0x12   :  { %33 = dma.hbm_to_vmem [thread:$0]  %s1216_s1, 512, %s28_s13, [#allocation9], %s821_s24, %s821_s24, %s822_s25  }
  0x13   :  { %s771_s30 = scalar_lea.hbm %s1215_s0, 512 }
  0x14   :  { %p772_p8 = scmp.ne.s32.totalorder %s1215_s0, %s771_s30  ;;  %p775_p9 = scmp.lt.u32.totalorder %s771_s30, %s1215_s0 }
  0x16   :  { %p777_p10 = pnand %p775_p9, %p772_p8 }
  0x18   :  { %780 = shalt.err (!%p777_p10)
}
  0x19   :  { %s781_s8 = scalar_lea.vmem %s847_s15, 512  ;;  %p786_p12 = scmp.lt.s32.totalorder %s847_s15, %s847_s15 }
  0x1a   :  { %p782_p11 = scmp.ne.s32.totalorder %s847_s15, %s781_s8  ;;  %p787_p13 = scmp.lt.s32.totalorder %s781_s8, %s781_s8 }
  0x1c   :  { %p788_p0 = por %p787_p13, %p786_p12 }
  0x1e   :  { %p789_p1 = pnand %p788_p0, %p782_p11 }
  0x20   :  { %792 = shalt.err (!%p789_p1)
}
  0x21   :  { %21 = dma.hbm_to_vmem [thread:$0]  %s1215_s0, 512, %s847_s15, [#allocation7], %s821_s24, %s821_s24, %s822_s25  }
  0x22   :  { %s823_s10 = smov [#allocation10]   ;;  %s793_s14 = scalar_lea.hbm %s1217_s2, 128 }
  0x23   :  { %s40_s11 = sshll.u32 %s823_s10, 4  ;;  %p794_p2 = scmp.ne.s32.totalorder %s1217_s2, %s793_s14  ;;  %s41_s11 = int_to_ptr.vmem [resolvable:$true] %s40_s11 }
  0x24   :  { %p797_p3 = scmp.lt.u32.totalorder %s793_s14, %s1217_s2 }
  0x26   :  { %p799_p4 = pnand %p797_p3, %p794_p2 }
  0x28   :  { %802 = shalt.err (!%p799_p4)
}
  0x29   :  { %s803_s20 = scalar_lea.vmem %s41_s11, 128  ;;  %p808_p6 = scmp.lt.s32.totalorder %s41_s11, %s41_s11 }
  0x2a   :  { %p804_p5 = scmp.ne.s32.totalorder %s41_s11, %s803_s20  ;;  %p809_p7 = scmp.lt.s32.totalorder %s803_s20, %s803_s20 }
  0x2c   :  { %p810_p8 = por %p809_p7, %p808_p6 }
  0x2e   :  { %p811_p9 = pnand %p810_p8, %p804_p5 }
  0x30   :  { %814 = shalt.err (!%p811_p9)
}
  0x31   :  { %43 = dma.hbm_to_vmem [thread:$0]  %s1217_s2, 128, %s41_s11, [#allocation9]  }
  0x32   :  { %815 = dma.done.wait [#allocation7], 512  }
  0x33   :  { %816 = vsyncadd [#allocation7], 4294966784 }
  0x34   :  { %817 = dma.done.wait [#allocation9], 640  }
  0x35   :  { %818 = vsyncadd [#allocation9], 4294966656  ;;  %vm89_vm0 = vcmask 261120   ;;  %v81_v0 = vld [vmem:[#allocation8] sm:$0xff]  ;;  %v82_v1 = vld [vmem:[#allocation8 + $0x8] sm:$0xff]  ;;  %v824_v10 = vmov 0  }
  0x36   :  { %v83_v2 = vld [vmem:[#allocation8 + $0x10] sm:$0xff]  ;;  %v671_v3 = vpack.c.bf16 %v82_v1, %v81_v0  ;;  %v84_v4 = vld [vmem:[#allocation8 + $0x18] sm:$0xff]  ;;  %v85_v5 = vld [vmem:[#allocation6] sm:$0xff]  ;;  %692 = vset.pattern.permute.xlu1 %v824_v10  ;;  %691 = vset.pattern.permute.xlu0 %v824_v10  ;;  %vm60_vm1 = vcmask 7168   ;;  %v825_v11 = vmov -1e+30  }
  0x37   :  { %v87_v6 = vld [vmem:[#allocation6 + $0x10] sm:$0xff]  ;;  %v675_v7 = vpack.c.bf16 %v84_v4, %v83_v2  ;;  %665 = vmatprep.mubr.msk.f32.mxu0 %vm89_vm0, %v85_v5  ;;  %v86_v8 = vld [vmem:[#allocation6 + $0x8] sm:$0xff]  ;;  %v88_v9 = vld [vmem:[#allocation6 + $0x18] sm:$0xff]  ;;  %68 = vst.msk [vmem:[#allocation4 + $0x18] sm:$0xff] %vm60_vm1, %v825_v11 }
  0x38   :  { %668 = vmatprep.mubr.msk.f32.mxu1 %vm89_vm0, %v87_v6  ;;  %672 = vmatprep.subr.bf16.mxu0 %v671_v3  ;;  %61 = vst.msk [vmem:[#allocation2] sm:$0xff] %vm60_vm1, %v825_v11  ;;  %62 = vst.msk [vmem:[#allocation2 + $0x8] sm:$0xff] %vm60_vm1, %v825_v11  ;;  %v187_v12 = vld [vmem:[#allocation10] sm:$0xff] }
  0x39   :  { %679 = vmatprep.subr.bf16.mxu1 %v671_v3  ;;  %674 = vmatpush3.bf16.msra.mxu0 %v671_v3  ;;  %63 = vst.msk [vmem:[#allocation2 + $0x10] sm:$0xff] %vm60_vm1, %v825_v11  ;;  %64 = vst.msk [vmem:[#allocation2 + $0x18] sm:$0xff] %vm60_vm1, %v825_v11  ;;  %v190_v13 = vand.u32 33686018, %v187_v12  ;;  %v188_v14 = vand.u32 16843009, %v187_v12 }
  0x3a   :  { %681 = vmatpush3.bf16.msra.mxu1 %v671_v3  ;;  %676 = vmatprep.subr.bf16.mxu0 %v675_v7  ;;  %65 = vst.msk [vmem:[#allocation4] sm:$0xff] %vm60_vm1, %v825_v11  ;;  %66 = vst.msk [vmem:[#allocation4 + $0x8] sm:$0xff] %vm60_vm1, %v825_v11 }
  0x3b   :  { %680 = vmatprep.subr.bf16.mxu1 %v675_v7  ;;  %67 = vst.msk [vmem:[#allocation4 + $0x10] sm:$0xff] %vm60_vm1, %v825_v11  ;;  %vm191_vm2 = vnez %v190_v13  ;;  %vm189_vm3 = vnez %v188_v14 }
  0x3c   :  { %v232_v15 = vsel %vm191_vm2, 16843009, %v824_v10  ;;  %v265_v18 = vsel %vm189_vm3, 16843009, %v824_v10 }
  0x3d   :  { %678 = vmatpush3.bf16.msra.mxu0 %v675_v7  ;;  %v236_v16 = vunpack.c.3.s8 %v232_v15  ;;  %v234_v17 = vunpack.c.1.s8 %v232_v15  ;;  %v235_v20 = vunpack.c.2.s8 %v232_v15  ;;  %v233_v22 = vunpack.c.0.s8 %v232_v15 }
  0x3e   :  { %682 = vmatpush3.bf16.msra.mxu1 %v675_v7  ;;  %v267_v23 = vunpack.c.1.s8 %v265_v18  ;;  %v266_v29 = vunpack.c.0.s8 %v265_v18  ;;  %v269_v31 = vunpack.c.3.s8 %v265_v18  ;;  %v268_v40 = vunpack.c.2.s8 %v265_v18 }
  0x3f   :  { %v243_v19 = vpack.c.b16 %v236_v16, %v236_v16  ;;  %v239_v21 = vpack.c.b16 %v234_v17, %v234_v17  ;;  %v241_v25 = vpack.c.b16 %v235_v20, %v235_v20  ;;  %v237_v27 = vpack.c.b16 %v233_v22, %v233_v22 }
  0x40   :  { %666 = vmatmul.mubr.msk.f32.vlgmr.msra.gmra.mrb[0].mxu0 %vm89_vm0, %v86_v8  ;;  %v272_v28 = vpack.c.b16 %v267_v23, %v267_v23  ;;  %v270_v34 = vpack.c.b16 %v266_v29, %v266_v29  ;;  %v276_v37 = vpack.c.b16 %v269_v31, %v269_v31  ;;  %v274_v55 = vpack.c.b16 %v268_v40, %v268_v40 }
  0x41   :  { %669 = vmatmul.mubr.msk.f32.vlgmr.msra.gmra.mrb[0].mxu1 %vm89_vm0, %v88_v9  ;;  %v244_v24 = vpack.c.b8 %v243_v19, %v243_v19  ;;  %v240_v26 = vpack.c.b8 %v239_v21, %v239_v21  ;;  %v242_v30 = vpack.c.b8 %v241_v25, %v241_v25  ;;  %v238_v32 = vpack.c.b8 %v237_v27, %v237_v27 }
  0x42   :  { %v273_v33 = vpack.c.b8 %v272_v28, %v272_v28  ;;  %v271_v38 = vpack.c.b8 %v270_v34, %v270_v34  ;;  %v277_v49 = vpack.c.b8 %v276_v37, %v276_v37  ;;  %v275_v12 = vpack.c.b8 %v274_v55, %v274_v55 }
  0x43   :  { %vm248_vm4 = vnez %v244_v24  ;;  %vm246_vm5 = vnez %v240_v26  ;;  %vm247_vm6 = vnez %v242_v30  ;;  %vm245_vm7 = vnez %v238_v32 }
  0x44   :  { %v252_v35 = vsel %vm248_vm4, 16843009, %v824_v10  ;;  %v250_v36 = vsel %vm246_vm5, 16843009, %v824_v10  ;;  %vm279_vm8 = vnez %v273_v33  ;;  %v251_v44 = vsel %vm247_vm6, 16843009, %v824_v10 }
  0x45   :  { %v256_v39 = vunpack.c.0.s8 %v252_v35  ;;  %v254_v43 = vunpack.c.0.s8 %v250_v36  ;;  %v249_v47 = vsel %vm245_vm7, 16843009, %v824_v10  ;;  %v283_v48 = vsel %vm279_vm8, 16843009, %v824_v10 }
  0x46   :  { %vm278_vm9 = vnez %v271_v38  ;;  %v255_v54 = vunpack.c.0.s8 %v251_v44  ;;  %v253_v58 = vunpack.c.0.s8 %v249_v47  ;;  %v287_v59 = vunpack.c.0.s8 %v283_v48 }
  0x47   :  { %vm911_vm10 = vcmp.ne.s32.totalorder %v256_v39, 0  ;;  %vm915_vm11 = vcmp.ne.s32.totalorder %v254_v43, 0  ;;  %v282_v62 = vsel %vm278_vm9, 16843009, %v824_v10  ;;  %vm920_vm12 = vnez %v277_v49 }
  0x48   :  { %vm924_vm13 = vcmp.ne.s32.totalorder %v255_v54, 0  ;;  %vm928_vm14 = vcmp.ne.s32.totalorder %v253_v58, 0  ;;  %v286_v24 = vunpack.c.0.s8 %v282_v62  ;;  %vm280_vm15 = vnez %v275_v12  ;;  %v998_v62 = vld [vmem:[#allocation4 + $0x8] sm:$0xff] }
  0x49   :  { %v285_v39 = vsel %vm920_vm12, 16843009, %v824_v10  ;;  %v284_v40 = vsel %vm280_vm15, 16843009, %v824_v10  ;;  %vm942_vm0 = vcmp.ne.s32.totalorder %v287_v59, 0 }
  0x4a   :  { %vm956_vm2 = vcmp.ne.s32.totalorder %v286_v24, 0  ;;  %v288_v49 = vunpack.c.0.s8 %v284_v40  ;;  %v1051_v24 = vld [vmem:[#allocation2 + $0x10] sm:$0xff] }
  0x4c   :  { %vm978_vm4 = vcmp.ne.s32.totalorder %v288_v49, 0 }
 0x113   :  { %v667_v41 = vpop.f32.mrb[0].mxu0 }
 0x114   :  { %v670_v42 = vpop.f32.mrb[0].mxu1  ;;  %v168_v45 = vpop.f32.mrb[1].mxu0  ;;  %v193_v50 = vsub.f32 1.25, %v667_v41  ;;  %v642_v3 = vadd.f32 0.25, %v667_v41  ;;  %v646_v19 = vadd.f32 -0.25, %v667_v41  ;;  %v638_v25 = vadd.f32 -0.75, %v667_v41 }
 0x115   :  { %v178_v46 = vpop.f32.mrb[1].mxu1  ;;  %v641_v51 = vadd.f32 0.25, %v168_v45  ;;  %v192_v52 = vsub.f32 1.25, %v168_v45  ;;  %v195_v60 = vsub.f32 1.25, %v670_v42  ;;  %v644_v61 = vadd.f32 0.25, %v670_v42 }
 0x116   :  { %v643_v56 = vadd.f32 0.25, %v178_v46  ;;  %v197_v0 = vmax.f32 %v193_v50, 0.0  ;;  %v194_v5 = vsub.f32 1.25, %v178_v46  ;;  %v648_v7 = vadd.f32 -0.25, %v670_v42 }
 0x117   :  { %v216_v1 = vmax.f32 %v641_v51, 0.0  ;;  %v196_v4 = vmax.f32 %v192_v52, 0.0  ;;  %v219_v6 = vmax.f32 %v644_v61, 0.0  ;;  %v217_v8 = vmax.f32 %v642_v3, 0.0  ;;  %v996_v61 = vld [vmem:[#allocation4 + $0x18] sm:$0xff]  ;;  %v1006_v3 = vld [vmem:[#allocation4 + $0x10] sm:$0xff] }
 0x118   :  { %v218_v2 = vmax.f32 %v643_v56, 0.0  ;;  %v199_v13 = vmax.f32 %v195_v60, 0.0  ;;  %v647_v14 = vadd.f32 -0.25, %v178_v46  ;;  %v201_v17 = vmul.f32 -256.0, %v197_v0 }
 0x119   :  { %v223_v15 = vmul.f32 256.0, %v219_v6  ;;  %v221_v18 = vmul.f32 256.0, %v217_v8  ;;  %v220_v20 = vmul.f32 256.0, %v216_v1  ;;  %v200_v21 = vmul.f32 -256.0, %v196_v4 }
 0x11a   :  { %v222_v16 = vmul.f32 256.0, %v218_v2  ;;  %v198_v22 = vmax.f32 %v194_v5, 0.0  ;;  %v645_v26 = vadd.f32 -0.25, %v168_v45  ;;  %v640_v28 = vadd.f32 -0.75, %v670_v42  ;;  %v1012_v5 = vld [vmem:[#allocation4] sm:$0xff] }
 0x11b   :  { %v231_v23 = vmul.f32 %v648_v7, %v223_v15  ;;  %v229_v27 = vmul.f32 %v646_v19, %v221_v18  ;;  %v637_v29 = vadd.f32 -0.75, %v168_v45  ;;  %v203_v32 = vmul.f32 -256.0, %v199_v13 }
 0x11c   :  { %v230_v31 = vmul.f32 %v647_v14, %v222_v16  ;;  %v228_v34 = vmul.f32 %v645_v26, %v220_v20  ;;  %v209_v35 = vmul.f32 %v638_v25, %v201_v17  ;;  %v202_v37 = vmul.f32 -256.0, %v198_v22  ;;  %v1025_v14 = vld [vmem:[#allocation2 + $0x8] sm:$0xff]  ;;  %v1031_v16 = vld [vmem:[#allocation2] sm:$0xff]  ;;  %v1045_v22 = vld [vmem:[#allocation2 + $0x18] sm:$0xff] }
 0x11d   :  { %v309_v30 = vsel %vm911_vm10, %v231_v23, -1e+30  ;;  %v307_v33 = vsel %vm915_vm11, %v229_v27, -1e+30  ;;  %v208_v36 = vmul.f32 %v637_v29, %v200_v21  ;;  %v639_v38 = vadd.f32 -0.75, %v178_v46 }
 0x11e   :  { %316 = vmax.xlane.f32.xlu1 %v309_v30  ;;  %312 = vmax.xlane.f32.xlu0 %v307_v33  ;;  %v308_v41 = vsel %vm924_vm13, %v230_v31, -1e+30  ;;  %v306_v43 = vsel %vm928_vm14, %v228_v34, -1e+30  ;;  %v950_v44 = vsel %vm915_vm11, %v229_v27, %v209_v35  ;;  %v211_v45 = vmul.f32 %v640_v28, %v203_v32 }
 0x11f   :  { %v289_v46 = vunpack.c.0.s8 %v285_v39  ;;  %v210_v47 = vmul.f32 %v639_v38, %v202_v37  ;;  %v954_v10 = vsel %vm928_vm14, %v228_v34, %v208_v36  ;;  %v295_v50 = vsel %vm942_vm0, %v950_v44, -1e+30 }
 0x120   :  { %v294_v51 = vsel %vm956_vm2, %v954_v10, -1e+30  ;;  %v968_v52 = vsel %vm911_vm10, %v231_v23, %v211_v45  ;;  %v826_v60 = vmov 0.0  }
 0x121   :  { %vm970_vm3 = vcmp.ne.s32.totalorder %v289_v46, 0  ;;  %v976_v55 = vsel %vm924_vm13, %v230_v31, %v210_v47  ;;  %70 = vst.msk [vmem:[#allocation3 + $0x8] sm:$0xff] %vm60_vm1, %v826_v60  ;;  %69 = vst.msk [vmem:[#allocation3] sm:$0xff] %vm60_vm1, %v826_v60 }
 0x122   :  { %314 = vmax.xlane.f32.xlu1 %v308_v41  ;;  %310 = vmax.xlane.f32.xlu0 %v306_v43  ;;  %v297_v58 = vsel %vm970_vm3, %v968_v52, -1e+30  ;;  %v296_v59 = vsel %vm978_vm4, %v976_v55, -1e+30  ;;  %71 = vst.msk [vmem:[#allocation3 + $0x10] sm:$0xff] %vm60_vm1, %v826_v60  ;;  %72 = vst.msk [vmem:[#allocation3 + $0x18] sm:$0xff] %vm60_vm1, %v826_v60 }
 0x123   :  { %73 = vst.msk [vmem:[#allocation5] sm:$0xff] %vm60_vm1, %v826_v60  ;;  %74 = vst.msk [vmem:[#allocation5 + $0x8] sm:$0xff] %vm60_vm1, %v826_v60 }
 0x124   :  { %75 = vst.msk [vmem:[#allocation5 + $0x10] sm:$0xff] %vm60_vm1, %v826_v60  ;;  %76 = vst.msk [vmem:[#allocation5 + $0x18] sm:$0xff] %vm60_vm1, %v826_v60 }
 0x126   :  { %300 = vmax.xlane.f32.xlu1 %v295_v50  ;;  %298 = vmax.xlane.f32.xlu0 %v294_v51 }
 0x12a   :  { %304 = vmax.xlane.f32.xlu1 %v297_v58  ;;  %302 = vmax.xlane.f32.xlu0 %v296_v59 }
 0x1ab   :  { %v317_v63 = vpop.xlane.xlu1 %316  ;;  %v313_v1 = vpop.xlane.xlu0 %312 }
 0x1ac   :  { %v1001_v0 = vmax.f32 %v996_v61, %v317_v63  ;;  %v1004_v2 = vmax.f32 %v998_v62, %v313_v1 }
 0x1ae   :  { %v462_v4 = vsub.f32 %v996_v61, %v1001_v0  ;;  %490 = vst.msk [vmem:[#allocation4 + $0x18] sm:$0xff] %vm60_vm1, %v1001_v0  ;;  %v460_v6 = vsub.f32 %v998_v62, %v1004_v2  ;;  %488 = vst.msk [vmem:[#allocation4 + $0x8] sm:$0xff] %vm60_vm1, %v1004_v2  ;;  %365 = vperm.xlu1 %692, %v1004_v2   ;;  %v424_v62 = vld [vmem:[#allocation3 + $0x10] sm:$0xff]  ;;  %v452_v61 = vld [vmem:[#allocation5 + $0x8] sm:$0xff] }
 0x1af   :  { %v315_v7 = vpop.xlane.xlu1 %314  ;;  %v311_v12 = vpop.xlane.xlu0 %310 }
 0x1b0   :  { %v1020_v8 = vmax.f32 %v1006_v3, %v315_v7  ;;  %v1023_v13 = vmax.f32 %v1012_v5, %v311_v12  ;;  %v465_v53 = vmul.f32 1.442695, %v460_v6  ;;  %v469_v2 = vmul.f32 1.442695, %v462_v4 }
 0x1b2   :  { %v461_v15 = vsub.f32 %v1006_v3, %v1020_v8  ;;  %489 = vst.msk [vmem:[#allocation4 + $0x10] sm:$0xff] %vm60_vm1, %v1020_v8  ;;  %v459_v17 = vsub.f32 %v1012_v5, %v1023_v13  ;;  %487 = vst.msk [vmem:[#allocation4] sm:$0xff] %vm60_vm1, %v1023_v13  ;;  %375 = vperm.xlu1 %692, %v1001_v0   ;;  %360 = vperm.xlu0 %691, %v1023_v13  }
 0x1b3   :  { %v301_v18 = vpop.xlane.xlu1 %300  ;;  %v299_v20 = vpop.xlane.xlu0 %298 }
 0x1b4   :  { %v1040_v19 = vmax.f32 %v1025_v14, %v301_v18  ;;  %v1043_v21 = vmax.f32 %v1031_v16, %v299_v20  ;;  %v463_v57 = vmul.f32 1.442695, %v459_v17 }
 0x1b6   :  { %v427_v23 = vsub.f32 %v1025_v14, %v1040_v19  ;;  %484 = vst.msk [vmem:[#allocation2 + $0x8] sm:$0xff] %vm60_vm1, %v1040_v19  ;;  %v426_v25 = vsub.f32 %v1031_v16, %v1043_v21  ;;  %483 = vst.msk [vmem:[#allocation2] sm:$0xff] %vm60_vm1, %v1043_v21  ;;  %370 = vperm.xlu1 %692, %v1020_v8   ;;  %v467_v14 = vmul.f32 1.442695, %v461_v15 }
 0x1b7   :  { %v305_v26 = vpop.xlane.xlu1 %304  ;;  %v303_v28 = vpop.xlane.xlu0 %302 }
 0x1b8   :  { %v1059_v27 = vmax.f32 %v1045_v22, %v305_v26  ;;  %v1062_v29 = vmax.f32 %v1051_v24, %v303_v28  ;;  %v432_v54 = vmul.f32 1.442695, %v427_v23  ;;  %v430_v17 = vmul.f32 1.442695, %v426_v25  ;;  %v451_v23 = vld [vmem:[#allocation5] sm:$0xff] }
 0x1ba   :  { %v429_v30 = vsub.f32 %v1045_v22, %v1059_v27  ;;  %486 = vst.msk [vmem:[#allocation2 + $0x18] sm:$0xff] %vm60_vm1, %v1059_v27  ;;  %v428_v31 = vsub.f32 %v1051_v24, %v1062_v29  ;;  %485 = vst.msk [vmem:[#allocation2 + $0x10] sm:$0xff] %vm60_vm1, %v1062_v29  ;;  %341 = vperm.xlu1 %692, %v1040_v19  }
 0x1bc   :  { %v434_v9 = vmul.f32 1.442695, %v428_v31  ;;  %v436_v48 = vmul.f32 1.442695, %v429_v30 }
 0x1be   :  { %336 = vperm.xlu1 %692, %v1043_v21  }
 0x1c2   :  { %346 = vperm.xlu1 %692, %v1062_v29  }
 0x1c6   :  { %351 = vperm.xlu1 %692, %v1059_v27   ;;  %v425_v27 = vld [vmem:[#allocation3 + $0x18] sm:$0xff] }
 0x22d   :  { %v366_v32 = vpop.permute.xlu1 %365 }
 0x22e   :  { %v379_v35 = vsub.f32 %v950_v44, %v366_v32 }
 0x230   :  { %v383_v39 = vsel %vm915_vm11, %v379_v35, -1e+30 }
 0x231   :  { %v376_v33 = vpop.permute.xlu1 %375  ;;  %v361_v37 = vpop.permute.xlu0 %360 }
 0x232   :  { %v378_v41 = vsub.f32 %v954_v10, %v361_v37  ;;  %v381_v58 = vsub.f32 %v968_v52, %v376_v33 }
 0x234   :  { %v382_v49 = vsel %vm928_vm14, %v378_v41, -1e+30  ;;  %v385_v12 = vsel %vm911_vm10, %v381_v58, -1e+30 }
 0x235   :  { %v371_v34 = vpop.permute.xlu1 %370 }
 0x236   :  { %v380_v47 = vsub.f32 %v976_v55, %v371_v34 }
 0x238   :  { %v384_v59 = vsel %vm924_vm13, %v380_v47, -1e+30  ;;  %v422_v47 = vld [vmem:[#allocation3] sm:$0xff] }
 0x239   :  { %v342_v36 = vpop.permute.xlu1 %341 }
 0x23a   :  { %v355_v38 = vsub.f32 %v950_v44, %v342_v36  ;;  %v423_v36 = vld [vmem:[#allocation3 + $0x8] sm:$0xff] }
 0x23c   :  { %v387_v40 = vsel %vm942_vm0, %v355_v38, %v383_v39  ;;  %v453_v39 = vld [vmem:[#allocation5 + $0x10] sm:$0xff] }
 0x23d   :  { %v392_v43 = vmul.f32 1.442695, %v387_v40  ;;  %v337_v45 = vpop.permute.xlu1 %336 }
 0x23e   :  { %v354_v46 = vsub.f32 %v954_v10, %v337_v45 }
 0x23f   :  { %693 = vpow2.f32 %v392_v43 }
 0x240   :  { %v386_v44 = vsel %vm956_vm2, %v354_v46, %v382_v49 }
 0x241   :  { %v347_v50 = vpop.permute.xlu1 %346  ;;  %v390_v60 = vmul.f32 1.442695, %v386_v44 }
 0x242   :  { %v356_v51 = vsub.f32 %v976_v55, %v347_v50 }
 0x244   :  { %v388_v10 = vsel %vm978_vm4, %v356_v51, %v384_v59 }
 0x245   :  { %v394_v63 = vmul.f32 1.442695, %v388_v10  ;;  %v352_v1 = vpop.permute.xlu1 %351 }
 0x246   :  { %v357_v7 = vsub.f32 %v968_v52, %v352_v1 }
 0x247   :  { %695 = vpow2.f32 %v394_v63 }
 0x248   :  { %v389_v55 = vsel %vm970_vm3, %v357_v7, %v385_v12  ;;  %697 = vpow2.f32 %v390_v60  ;;  %v454_v60 = vld [vmem:[#allocation5 + $0x18] sm:$0xff] }
 0x249   :  { %v694_v18 = vpop.eup %693  ;;  %v396_v20 = vmul.f32 1.442695, %v389_v55 }
 0x24a   :  { %v399_v24 = vsel %vm942_vm0, %v694_v18, 0.0  ;;  %v411_v34 = vsel %vm915_vm11, %v694_v18, 0.0 }
 0x24b   :  { %699 = vpow2.f32 %v396_v20  ;;  %404 = vadd.xlane.f32.xlu0 %v399_v24 }
 0x24c   :  { %701 = vpow2.f32 %v432_v54 }
 0x24d   :  { %703 = vpow2.f32 %v434_v9 }
 0x24e   :  { %705 = vpow2.f32 %v463_v57 }
 0x24f   :  { %707 = vpow2.f32 %v436_v48 }
 0x250   :  { %709 = vpow2.f32 %v465_v53 }
 0x251   :  { %v696_v26 = vpop.eup %695  ;;  %711 = vpow2.f32 %v467_v14 }
 0x252   :  { %v400_v28 = vsel %vm978_vm4, %v696_v26, 0.0  ;;  %v698_v52 = vpop.eup %697  ;;  %v412_v42 = vsel %vm924_vm13, %v696_v26, 0.0  ;;  %713 = vpow2.f32 %v430_v17 }
 0x253   :  { %406 = vadd.xlane.f32.xlu0 %v400_v28  ;;  %v410_v32 = vsel %vm928_vm14, %v698_v52, 0.0  ;;  %v398_v56 = vsel %vm956_vm2, %v698_v52, 0.0  ;;  %715 = vpow2.f32 %v469_v2 }
 0x255   :  { %v700_v29 = vpop.eup %699 }
 0x256   :  { %v401_v33 = vsel %vm970_vm3, %v700_v29, 0.0  ;;  %v413_v11 = vsel %vm911_vm10, %v700_v29, 0.0  ;;  %v702_v35 = vpop.eup %701 }
 0x257   :  { %414 = vadd.xlane.f32.xlu0 %v410_v32  ;;  %408 = vadd.xlane.f32.xlu1 %v401_v33  ;;  %v439_v19 = vmul.f32 %v702_v35, %v423_v36  ;;  %v704_v22 = vpop.eup %703 }
 0x258   :  { %v706_v3 = vpop.eup %705  ;;  %v440_v6 = vmul.f32 %v704_v22, %v424_v62  ;;  %v547_v22 = vld [vmem:[#allocation4 + $0x8] sm:$0xff] }
 0x259   :  { %v708_v8 = vpop.eup %707  ;;  %v471_v16 = vmul.f32 %v706_v3, %v451_v23  ;;  %v527_v62 = vld [vmem:[#allocation2 + $0x8] sm:$0xff] }
 0x25a   :  { %v710_v31 = vpop.eup %709  ;;  %v441_v21 = vmul.f32 %v708_v8, %v425_v27 }
 0x25b   :  { %418 = vadd.xlane.f32.xlu0 %v412_v42  ;;  %416 = vadd.xlane.f32.xlu1 %v411_v34  ;;  %v712_v25 = vpop.eup %711  ;;  %v472_v41 = vmul.f32 %v710_v31, %v452_v61  ;;  %v546_v31 = vld [vmem:[#allocation4] sm:$0xff] }
 0x25c   :  { %v473_v40 = vmul.f32 %v712_v25, %v453_v39  ;;  %v714_v43 = vpop.eup %713 }
 0x25d   :  { %v438_v58 = vmul.f32 %v714_v43, %v422_v47  ;;  %v716_v59 = vpop.eup %715  ;;  %v549_v43 = vld [vmem:[#allocation4 + $0x18] sm:$0xff] }
 0x25e   :  { %v474_v55 = vmul.f32 %v716_v59, %v454_v60 }
 0x25f   :  { %402 = vadd.xlane.f32.xlu1 %v398_v56 }
 0x263   :  { %420 = vadd.xlane.f32.xlu1 %v413_v11 }
 0x2d8   :  { %v405_v5 = vpop.xlane.xlu0 %404 }
 0x2d9   :  { %v443_v13 = vadd.f32 %v439_v19, %v405_v5  ;;  %v548_v19 = vld [vmem:[#allocation4 + $0x10] sm:$0xff] }
 0x2da   :  { %v528_v5 = vld [vmem:[#allocation2 + $0x10] sm:$0xff] }
 0x2db   :  { %448 = vst.msk [vmem:[#allocation3 + $0x8] sm:$0xff] %vm60_vm1, %v443_v13 }
 0x2e0   :  { %v407_v15 = vpop.xlane.xlu0 %406 }
 0x2e1   :  { %v444_v30 = vadd.f32 %v440_v6, %v407_v15 }
 0x2e2   :  { %v1143_v51 = vld [vmem:[#allocation3 + $0x8] sm:$0xff] }
 0x2e3   :  { %449 = vst.msk [vmem:[#allocation3 + $0x10] sm:$0xff] %vm60_vm1, %v444_v30  ;;  %v515_v7 = vmax.f32 %v1143_v51, 1e-30  ;;  %vm503_vm5 = vcmp.gt.f32.partialorder %v1143_v51, 0.0 }
 0x2e4   :  { %v415_v37 = vpop.xlane.xlu0 %414  ;;  %v409_v38 = vpop.xlane.xlu1 %408 }
 0x2e5   :  { %v475_v0 = vadd.f32 %v471_v16, %v415_v37  ;;  %v445_v4 = vadd.f32 %v441_v21, %v409_v38  ;;  %v526_v16 = vld [vmem:[#allocation2] sm:$0xff] }
 0x2e7   :  { %479 = vst.msk [vmem:[#allocation5] sm:$0xff] %vm60_vm1, %v475_v0  ;;  %450 = vst.msk [vmem:[#allocation3 + $0x18] sm:$0xff] %vm60_vm1, %v445_v4 }
 0x2e8   :  { %v419_v45 = vpop.xlane.xlu0 %418  ;;  %v417_v46 = vpop.xlane.xlu1 %416 }
 0x2e9   :  { %v477_v49 = vadd.f32 %v473_v40, %v419_v45  ;;  %v476_v50 = vadd.f32 %v472_v41, %v417_v46  ;;  %v529_v45 = vld [vmem:[#allocation2 + $0x18] sm:$0xff] }
 0x2ea   :  { %v1141_v44 = vld [vmem:[#allocation3 + $0x10] sm:$0xff] }
 0x2eb   :  { %481 = vst.msk [vmem:[#allocation5 + $0x10] sm:$0xff] %vm60_vm1, %v477_v49  ;;  %480 = vst.msk [vmem:[#allocation5 + $0x8] sm:$0xff] %vm60_vm1, %v476_v50  ;;  %v516_v63 = vmax.f32 %v1141_v44, 1e-30  ;;  %vm504_vm10 = vcmp.gt.f32.partialorder %v1141_v44, 0.0 }
 0x2ec   :  { %v403_v10 = vpop.xlane.xlu1 %402 }
 0x2ed   :  { %v442_v1 = vadd.f32 %v438_v58, %v403_v10  ;;  %717 = vlog2.f32 %v516_v63 }
 0x2ee   :  { %v1149_v12 = vld [vmem:[#allocation5] sm:$0xff]  ;;  %v1153_v24 = vld [vmem:[#allocation3 + $0x18] sm:$0xff]  ;;  %719 = vlog2.f32 %v515_v7 }
 0x2ef   :  { %447 = vst.msk [vmem:[#allocation3] sm:$0xff] %vm60_vm1, %v442_v1  ;;  %v534_v18 = vmax.f32 %v1149_v12, 1e-30  ;;  %v517_v33 = vmax.f32 %v1153_v24, 1e-30  ;;  %vm506_vm15 = vcmp.gt.f32.partialorder %v1149_v12, 0.0 }
 0x2f0   :  { %v421_v20 = vpop.xlane.xlu1 %420  ;;  %vm505_vm4 = vcmp.gt.f32.partialorder %v1153_v24, 0.0 }
 0x2f1   :  { %v478_v26 = vadd.f32 %v474_v55, %v421_v20  ;;  %721 = vlog2.f32 %v534_v18 }
 0x2f2   :  { %v1155_v28 = vld [vmem:[#allocation5 + $0x10] sm:$0xff]  ;;  %v1157_v52 = vld [vmem:[#allocation5 + $0x8] sm:$0xff] }
 0x2f3   :  { %v536_v29 = vmax.f32 %v1155_v28, 1e-30  ;;  %v535_v32 = vmax.f32 %v1157_v52, 1e-30  ;;  %482 = vst.msk [vmem:[#allocation5 + $0x18] sm:$0xff] %vm60_vm1, %v478_v26  ;;  %vm508_vm6 = vcmp.gt.f32.partialorder %v1155_v28, 0.0 }
 0x2f4   :  { %vm507_vm8 = vcmp.gt.f32.partialorder %v1157_v52, 0.0  ;;  %vm512_vm12 = vmand %vm504_vm10, %vm508_vm6 }
 0x2f5   :  { %723 = vlog2.f32 %v536_v29  ;;  %vm511_vm13 = vmand %vm503_vm5, %vm507_vm8 }
 0x2f6   :  { %725 = vlog2.f32 %v535_v32  ;;  %v1163_v42 = vld [vmem:[#allocation3] sm:$0xff] }
 0x2f7   :  { %v514_v34 = vmax.f32 %v1163_v42, 1e-30  ;;  %727 = vlog2.f32 %v517_v33  ;;  %v718_v11 = vpop.eup %717  ;;  %vm502_vm11 = vcmp.gt.f32.partialorder %v1163_v42, 0.0 }
 0x2f8   :  { %v720_v9 = vpop.eup %719  ;;  %v523_v48 = vmul.f32 0.6931472, %v718_v11  ;;  %vm510_vm0 = vmand %vm502_vm11, %vm506_vm15 }
 0x2f9   :  { %729 = vlog2.f32 %v514_v34  ;;  %v521_v36 = vmul.f32 0.6931472, %v720_v9 }
 0x2fa   :  { %v1166_v56 = vld [vmem:[#allocation5 + $0x18] sm:$0xff]  ;;  %v532_v2 = vadd.f32 %v528_v5, %v523_v48 }
 0x2fb   :  { %v537_v54 = vmax.f32 %v1166_v56, 1e-30  ;;  %v722_v57 = vpop.eup %721  ;;  %v531_v15 = vadd.f32 %v527_v62, %v521_v36  ;;  %vm509_vm2 = vcmp.gt.f32.partialorder %v1166_v56, 0.0 }
 0x2fc   :  { %v539_v3 = vmul.f32 0.6931472, %v722_v57  ;;  %vm513_vm5 = vmand %vm505_vm4, %vm509_vm2 }
 0x2fd   :  { %731 = vlog2.f32 %v537_v54 }
 0x2fe   :  { %v550_v25 = vadd.f32 %v546_v31, %v539_v3 }
 0x2ff   :  { %v724_v35 = vpop.eup %723 }
 0x300   :  { %v726_v53 = vpop.eup %725  ;;  %v543_v14 = vmul.f32 0.6931472, %v724_v35 }
 0x301   :  { %v541_v13 = vmul.f32 0.6931472, %v726_v53  ;;  %v728_v17 = vpop.eup %727 }
 0x302   :  { %v552_v6 = vadd.f32 %v548_v19, %v543_v14  ;;  %v525_v37 = vmul.f32 0.6931472, %v728_v17 }
 0x303   :  { %v730_v8 = vpop.eup %729  ;;  %v551_v23 = vadd.f32 %v547_v22, %v541_v13 }
 0x304   :  { %v1169_v27 = vadd.f32 %v552_v6, %v532_v2  ;;  %v519_v30 = vmul.f32 0.6931472, %v730_v8  ;;  %v533_v47 = vadd.f32 %v529_v45, %v525_v37 }
 0x305   :  { %v1171_v21 = vadd.f32 %v551_v23, %v531_v15 }
 0x306   :  { %v564_v38 = vand.u32 2147483647, %v1169_v27  ;;  %v530_v39 = vadd.f32 %v526_v16, %v519_v30  ;;  %v560_v19 = vmax.f32 %v1169_v27, 0.0 }
 0x307   :  { %v732_v61 = vpop.eup %731  ;;  %v563_v0 = vand.u32 2147483647, %v1171_v21  ;;  %v559_v15 = vmax.f32 %v1171_v21, 0.0 }
 0x308   :  { %v568_v4 = vsub.f32 0.0, %v564_v38  ;;  %v1175_v40 = vadd.f32 %v550_v25, %v530_v39  ;;  %v545_v41 = vmul.f32 0.6931472, %v732_v61 }
 0x309   :  { %v567_v46 = vsub.f32 0.0, %v563_v0 }
 0x30a   :  { %v574_v49 = vmul.f32 1.442695, %v568_v4  ;;  %v562_v50 = vand.u32 2147483647, %v1175_v40  ;;  %v553_v58 = vadd.f32 %v549_v43, %v545_v41  ;;  %v558_v52 = vmax.f32 %v1175_v40, 0.0 }
 0x30b   :  { %v572_v59 = vmul.f32 1.442695, %v567_v46 }
 0x30c   :  { %733 = vpow2.f32 %v574_v49  ;;  %v566_v10 = vsub.f32 0.0, %v562_v50  ;;  %v1178_v60 = vadd.f32 %v553_v58, %v533_v47 }
 0x30d   :  { %735 = vpow2.f32 %v572_v59 }
 0x30e   :  { %v570_v63 = vmul.f32 1.442695, %v566_v10  ;;  %v565_v1 = vand.u32 2147483647, %v1178_v60  ;;  %v561_v40 = vmax.f32 %v1178_v60, 0.0 }
 0x310   :  { %737 = vpow2.f32 %v570_v63  ;;  %v569_v7 = vsub.f32 0.0, %v565_v1 }
 0x312   :  { %v576_v55 = vmul.f32 1.442695, %v569_v7 }
 0x314   :  { %739 = vpow2.f32 %v576_v55 }
 0x316   :  { %v734_v18 = vpop.eup %733 }
 0x317   :  { %v736_v20 = vpop.eup %735  ;;  %v596_v26 = vadd.f32 1.0, %v734_v18  ;;  %v599_v34 = vmul.f32 -0.5, %v734_v18  ;;  %v602_v35 = vand.u32 2147483647, %v734_v18 }
 0x318   :  { %v587_v29 = vadd.f32 1.0, %v736_v20  ;;  %v590_v11 = vmul.f32 -0.5, %v736_v20  ;;  %v593_v53 = vand.u32 2147483647, %v736_v20 }
 0x319   :  { %741 = vlog2.f32 %v596_v26  ;;  %v600_v57 = vadd.f32 1.0, %v599_v34  ;;  %vm603_vm7 = vcmp.lt.f32.partialorder %v602_v35, 0.0004427343 }
 0x31a   :  { %v738_v32 = vpop.eup %737  ;;  %743 = vlog2.f32 %v587_v29  ;;  %v591_v36 = vadd.f32 1.0, %v590_v11  ;;  %vm594_vm9 = vcmp.lt.f32.partialorder %v593_v53, 0.0004427343 }
 0x31b   :  { %v578_v33 = vadd.f32 1.0, %v738_v32  ;;  %v581_v48 = vmul.f32 -0.5, %v738_v32  ;;  %v601_v17 = vmul.f32 %v734_v18, %v600_v57  ;;  %v584_v6 = vand.u32 2147483647, %v738_v32 }
 0x31c   :  { %v592_v3 = vmul.f32 %v736_v20, %v591_v36 }
 0x31d   :  { %745 = vlog2.f32 %v578_v33  ;;  %v582_v22 = vadd.f32 1.0, %v581_v48  ;;  %vm585_vm14 = vcmp.lt.f32.partialorder %v584_v6, 0.0004427343 }
 0x31e   :  { %v740_v54 = vpop.eup %739 }
 0x31f   :  { %v605_v9 = vadd.f32 1.0, %v740_v54  ;;  %v608_v62 = vmul.f32 -0.5, %v740_v54  ;;  %v583_v25 = vmul.f32 %v738_v32, %v582_v22  ;;  %v611_v21 = vand.u32 2147483647, %v740_v54 }
 0x321   :  { %747 = vlog2.f32 %v605_v9  ;;  %v609_v37 = vadd.f32 1.0, %v608_v62  ;;  %vm612_vm3 = vcmp.lt.f32.partialorder %v611_v21, 0.0004427343 }
 0x323   :  { %v742_v14 = vpop.eup %741  ;;  %v610_v0 = vmul.f32 %v740_v54, %v609_v37 }
 0x324   :  { %v744_v5 = vpop.eup %743  ;;  %v598_v13 = vmul.f32 0.6931472, %v742_v14 }
 0x325   :  { %v589_v2 = vmul.f32 0.6931472, %v744_v5 }
 0x326   :  { %v604_v8 = vsel %vm603_vm7, %v601_v17, %v598_v13 }
 0x327   :  { %v746_v23 = vpop.eup %745  ;;  %v616_v30 = vadd.f32 %v604_v8, %v560_v19  ;;  %v595_v27 = vsel %vm594_vm9, %v592_v3, %v589_v2 }
 0x328   :  { %v615_v31 = vadd.f32 %v595_v27, %v559_v15  ;;  %v580_v16 = vmul.f32 0.6931472, %v746_v23 }
 0x329   :  { %v620_v38 = vsel %vm512_vm12, %v616_v30, 0.0 }
 0x32a   :  { %624 = vst.msk [vmem:[%s1218_s3 + $0x10] sm:$0xff] %vm60_vm1, %v620_v38  ;;  %v619_v44 = vsel %vm511_vm13, %v615_v31, 0.0  ;;  %v586_v28 = vsel %vm585_vm14, %v583_v25, %v580_v16 }
 0x32b   :  { %v748_v39 = vpop.eup %747  ;;  %623 = vst.msk [vmem:[%s1218_s3 + $0x8] sm:$0xff] %vm60_vm1, %v619_v44  ;;  %v614_v51 = vadd.f32 %v586_v28, %v558_v52 }
 0x32c   :  { %v607_v61 = vmul.f32 0.6931472, %v748_v39 }
 0x32d   :  { %v618_v4 = vsel %vm510_vm0, %v614_v51, 0.0 }
 0x32e   :  { %622 = vst.msk [vmem:[%s1218_s3] sm:$0xff] %vm60_vm1, %v618_v4  ;;  %v613_v12 = vsel %vm612_vm3, %v610_v0, %v607_v61 }
 0x32f   :  { %v617_v41 = vadd.f32 %v613_v12, %v561_v40 }
 0x331   :  { %v621_v42 = vsel %vm513_vm5, %v617_v41, 0.0 }
 0x332   :  { %625 = vst.msk [vmem:[%s1218_s3 + $0x18] sm:$0xff] %vm60_vm1, %v621_v42 }
 0x333   :  { %630 = vsyncpa [#allocation7], 1 }
 0x334   :  { %631 = vsyncpa [#allocation9], 1 }

</bundles_post_ra>
